<compile_context>
chip_gen: v6e
topology: v6e:2x2x1
jax: 0.10.0
libtpu: 0.0.40
codegen_flags: <defaults>
</compile_context>

<pallas_src>
import functools

import jax
import jax.numpy as jnp
from jax import lax
from jax.experimental import pallas as pl
from jax.experimental.pallas import tpu as pltpu


# --------------------------------------------------------------------------- kernel
def bottleneck_kernel(x_ref, b1w_ref, b1b_ref, m2_ref, b2b_ref, b3w_ref, b3b_ref,
                      o_ref, *, compute_dtype):
    """conv1x1+BN+ReLU -> conv3x3+BN+ReLU -> conv1x1+BN + residual + ReLU."""
    bt, H, WCin = x_ref.shape
    WW = m2_ref.shape[0]          # W * width
    WCout = b3w_ref.shape[1]      # W * co4  (== WCin for the Identity path)
    R = bt * H
    cdt = compute_dtype

    # Leading-dim merge is a layout no-op; lanes stay 512-dense.
    x_rows = x_ref[...].reshape(R, WCin).astype(cdt)

    # ---- conv1 (1x1) + folded bn1 + relu : one lane-dense 2-D matmul --------
    h1 = jnp.dot(x_rows, b1w_ref[...], preferred_element_type=jnp.float32)
    h1 = jnp.maximum(h1 + b1b_ref[...], 0.0)                     # (R, WW) f32

    # ---- conv2 (3x3, pad=1, stride=1) + folded bn2 + relu -------------------
    # One matmul against the 3 stacked row-tap matrices, then combine vertical
    # taps with two sublane row shifts.  No 9-way lane-offset im2col concat.
    p = jnp.dot(h1.astype(cdt), m2_ref[...], preferred_element_type=jnp.float32)
    p0, p1, p2 = p[:, :WW], p[:, WW:2 * WW], p[:, 2 * WW:]       # tile-aligned slices
    zrow = jnp.zeros((1, WW), jnp.float32)
    p0s = jnp.concatenate([zrow, p0[:-1]], axis=0)               # out[h] term from row h-1
    p2s = jnp.concatenate([p2[1:], zrow], axis=0)                # out[h] term from row h+1
    if bt > 1:  # zero shifted terms that crossed an image boundary inside the tile
        r = lax.broadcasted_iota(jnp.int32, (R, 1), 0) % H
        p0s = jnp.where(r == 0, 0.0, p0s)
        p2s = jnp.where(r == H - 1, 0.0, p2s)
    h2 = jnp.maximum(p0s + p1 + p2s + b2b_ref[...], 0.0)         # (R, WW) f32

    # ---- conv3 (1x1) + folded bn3 + residual (Identity downsample) + relu ---
    h3 = jnp.dot(h2.astype(cdt), b3w_ref[...], preferred_element_type=jnp.float32)
    h3 = h3 + b3b_ref[...]
    x_res = x_ref[...].reshape(R, WCout)                         # re-read: short live range
    out = jnp.maximum(x_res + h3, 0.0)                           # f32 residual add
    o_ref[...] = out.reshape(bt, H, WCout).astype(o_ref.dtype)   # lane-dense store


# --------------------------------------------------------------------------- wrapper
def fold_bn(params):
    """Fold eval-mode BN scale into the conv weights (f32); keep biases separate."""
    w1, s1, b1, w2, s2, b2, w3, s3, b3 = params
    return (w1 * s1.reshape(1, -1), b1.reshape(-1),
            w2 * s2.reshape(1, 1, 1, -1), b2.reshape(-1),
            w3 * s3.reshape(1, -1), b3.reshape(-1))


def _pack_weights(folded, W, compute_dtype):
    """Pack folded conv weights into lane-dense matmul operands (packed-row layout)."""
    w1f, b1, w2f, b2, w3f, b3 = folded
    Cin, width = w1f.shape
    co4 = w3f.shape[1]
    eye_w = jnp.eye(W, dtype=jnp.float32)

    # 1x1 convs -> block-diagonal (W*Cin, W*Cout) matrices.
    b1w = jnp.einsum('uv,cd->ucvd', eye_w, w1f).reshape(W * Cin, W * width)
    b3w = jnp.einsum('uv,cd->ucvd', eye_w, w3f).reshape(W * width, W * co4)

    # 3x3 conv -> one (W*width, W*width) block-tridiagonal matrix per vertical
    # tap kh; horizontal taps + W-edge zero padding live inside the matrix.
    wi = jnp.arange(W)
    d = wi[:, None] - wi[None, :] + 1                            # w' - w + 1
    valid = ((d >= 0) & (d <= 2)).astype(jnp.float32)
    blk = w2f[:, jnp.clip(d, 0, 2)] * valid[None, :, :, None, None]   # (3,W,W,width,width)
    m2 = blk.transpose(0, 1, 3, 2, 4).reshape(3, W * width, W * width)
    m2 = jnp.concatenate([m2[0], m2[1], m2[2]], axis=1)          # (W*width, 3*W*width)

    b1b = jnp.tile(b1, W).reshape(1, W * width)
    b2b = jnp.tile(b2, W).reshape(1, W * width)
    b3b = jnp.tile(b3, W).reshape(1, W * co4)
    cd = compute_dtype
    return (b1w.astype(cd), b1b, m2.astype(cd), b2b, b3w.astype(cd), b3b)


def _pick_batch_tile(n):
    """v7x: 2 TensorCores -> keep >=2 parallel grid steps.  v5e/v6e: 1 TC ->
    a single grid step avoids ~0.35us/step overhead and doubles matmul M."""
    try:
        kind = jax.devices()[0].device_kind.lower()
    except Exception:
        kind = ""
    if ("v7" in kind or "tpu7" in kind) and n > 1:
        return n // 2 if n % 2 == 0 else 1
    return n


def bottleneck_pallas(x, folded_params, *, batch_tile=None, compute_dtype=jnp.bfloat16):
    """x: (N, H, W, Cin) float32 NHWC.  Identity downsample (stride=1, Cin == 4*out_ch)."""
    N, H, W, Cin = x.shape
    w1f, _, _, _, w3f, _ = folded_params
    co4 = w3f.shape[1]
    assert Cin == co4, "Identity downsample requires in_channels == out_channels * 4"
    if batch_tile is None:
        batch_tile = _pick_batch_tile(N)
    assert N % batch_tile == 0

    b1w, b1b, m2, b2b, b3w, b3b = _pack_weights(folded_params, W, compute_dtype)

    # Lane-dense I/O layout (free row-major metadata reshape wrapper-side).
    x_packed = x.reshape(N, H, W * Cin)

    kernel = functools.partial(bottleneck_kernel, compute_dtype=compute_dtype)

    def const_spec(arr):
        nd = arr.ndim
        return pl.BlockSpec(arr.shape, lambda n, _nd=nd: (0,) * _nd)

    out = pl.pallas_call(
        kernel,
        out_shape=jax.ShapeDtypeStruct((N, H, W * co4), x.dtype),
        grid_spec=pltpu.PrefetchScalarGridSpec(
            num_scalar_prefetch=0,
            grid=(N // batch_tile,),
            in_specs=[
                pl.BlockSpec((batch_tile, H, W * Cin), lambda n: (n, 0, 0)),
                const_spec(b1w), const_spec(b1b),
                const_spec(m2), const_spec(b2b),
                const_spec(b3w), const_spec(b3b),
            ],
            out_specs=pl.BlockSpec((batch_tile, H, W * co4), lambda n: (n, 0, 0)),
        ),
        compiler_params=pltpu.CompilerParams(
            dimension_semantics=("parallel",)),
    )(x_packed, b1w, b1b, m2, b2b, b3w, b3b)
    return out.reshape(N, H, W, co4)


# --------------------------------------------------------------------------- reference
def bottleneck_ref(x, folded_params, *, compute_dtype=jnp.bfloat16):
    """Pure-JAX reference (XLA convs) with the same folded-BN / mixed precision."""
    w1f, b1, w2f, b2, w3f, b3 = folded_params
    dn = ('NHWC', 'HWIO', 'NHWC')

    def conv(a, w, pad):
        return lax.conv_general_dilated(
            a.astype(compute_dtype), w.astype(compute_dtype), (1, 1), pad,
            dimension_numbers=dn, preferred_element_type=jnp.float32)

    h = jnp.maximum(conv(x, w1f[None, None], 'VALID') + b1, 0.0)
    h = jnp.maximum(conv(h, w2f, 'SAME') + b2, 0.0)
    h = conv(h, w3f[None, None], 'VALID') + b3
    return jnp.maximum(x + h, 0.0)


def make_params(key, in_channels, out_channels, base_width=64, groups=1, eps=1e-5):
    width = int(out_channels * (base_width / 64.0)) * groups
    co4 = out_channels * 4  # BottleNeck.factor

    keys = jax.random.split(key, 15)
    w1 = jax.random.normal(keys[0], (in_channels, width), jnp.float32) * 0.1
    w2 = jax.random.normal(keys[1], (3, 3, width, width), jnp.float32) * 0.1
    w3 = jax.random.normal(keys[2], (width, co4), jnp.float32) * 0.1

    def bn(kg, kb, km, kv, c):
        gamma = 1.0 + 0.1 * jax.random.normal(kg, (c,), jnp.float32)
        beta = 0.1 * jax.random.normal(kb, (c,), jnp.float32)
        mean = 0.1 * jax.random.normal(km, (c,), jnp.float32)
        var = jnp.abs(jax.random.normal(kv, (c,), jnp.float32)) + 0.5
        scale = gamma * jax.lax.rsqrt(var + eps)
        bias = beta - mean * scale
        return scale.reshape(1, c), bias.reshape(1, c)

    s1, b1 = bn(keys[3], keys[4], keys[5], keys[6], width)
    s2, b2 = bn(keys[7], keys[8], keys[9], keys[10], width)
    s3, b3 = bn(keys[11], keys[12], keys[13], keys[14], co4)
    return (w1, s1, b1, w2, s2, b2, w3, s3, b3)


if __name__ == "__main__":
    # BottleNeck(in_channels=32, out_channels=8, stride=1, norm_layer=BatchNorm2d,
    #            downsample=None)  ->  width=8, conv3 out = 32 channels == in_channels.
    N, H, W = 2, 16, 16
    in_channels, out_channels = 32, 8

    key = jax.random.PRNGKey(0)
    kx, kp = jax.random.split(key)
    x = jax.random.normal(kx, (N, H, W, in_channels), jnp.float32)
    params = make_params(kp, in_channels, out_channels)
    folded = fold_bn(params)

    out = bottleneck_pallas(x, folded)
    out = jax.block_until_ready(out)

    ref = bottleneck_ref(x, folded)
    assert out.shape == (N, H, W, out_channels * 4)
    err = jnp.max(jnp.abs(out - ref))
    # Same bf16-rounded folded weights feed kernel and reference; remaining
    # differences are f32 accumulation order only.  5e-3 is conservative.
    assert jnp.allclose(out, ref, atol=5e-3, rtol=5e-3), f"max abs err = {err}"
    print("KERNEL_OK")
</pallas_src>

<mosaic_0001>
module attributes {stable_mosaic.version = 11 : i64} {
  func.func @bottleneck_kernel(%arg0: i32, %arg1: memref<2x16x512xf32, #tpu.memory_space<vmem>>, %arg2: memref<512x128xbf16, #tpu.memory_space<vmem>>, %arg3: memref<1x128xf32, #tpu.memory_space<vmem>>, %arg4: memref<128x384xbf16, #tpu.memory_space<vmem>>, %arg5: memref<1x128xf32, #tpu.memory_space<vmem>>, %arg6: memref<128x512xbf16, #tpu.memory_space<vmem>>, %arg7: memref<1x512xf32, #tpu.memory_space<vmem>>, %arg8: memref<2x16x512xf32, #tpu.memory_space<vmem>>) attributes {dimension_semantics = [#tpu.dimension_semantics<parallel>], iteration_bounds = array<i64: 1>, scalar_prefetch = 0 : i64, scratch_operands = 0 : i64, tpu.core_type = #tpu.core_type<tc>, window_params = [{transform_indices = @transform_0, window_bounds = array<i64: 2, 16, 512>}, {pipeline_mode = #tpu.pipeline_mode<synchronous>, transform_indices = @transform_1, window_bounds = array<i64: 512, 128>}, {pipeline_mode = #tpu.pipeline_mode<synchronous>, transform_indices = @transform_2, window_bounds = array<i64: 1, 128>}, {pipeline_mode = #tpu.pipeline_mode<synchronous>, transform_indices = @transform_3, window_bounds = array<i64: 128, 384>}, {pipeline_mode = #tpu.pipeline_mode<synchronous>, transform_indices = @transform_4, window_bounds = array<i64: 1, 128>}, {pipeline_mode = #tpu.pipeline_mode<synchronous>, transform_indices = @transform_5, window_bounds = array<i64: 128, 512>}, {pipeline_mode = #tpu.pipeline_mode<synchronous>, transform_indices = @transform_6, window_bounds = array<i64: 1, 512>}, {transform_indices = @transform_7, window_bounds = array<i64: 2, 16, 512>}]} {
    %c0 = arith.constant 0 : index
    %c0_0 = arith.constant 0 : index
    %c0_1 = arith.constant 0 : index
    %0 = vector.load %arg1[%c0, %c0_0, %c0_1] : memref<2x16x512xf32, #tpu.memory_space<vmem>>, vector<2x16x512xf32>
    %1 = vector.shape_cast %0 : vector<2x16x512xf32> to vector<32x512xf32>
    %2 = arith.truncf %1 : vector<32x512xf32> to vector<32x512xbf16>
    %c0_2 = arith.constant 0 : index
    %c0_3 = arith.constant 0 : index
    %3 = vector.load %arg2[%c0_2, %c0_3] : memref<512x128xbf16, #tpu.memory_space<vmem>>, vector<512x128xbf16>
    %cst = arith.constant dense<0.000000e+00> : vector<32x128xf32>
    %4 = tpu.matmul %2, %3, %cst {dimension_numbers = #tpu.dot_dimension_numbers<[1], [0], [0], [1], [0, 0, 1, 1], [], []>} : vector<32x512xbf16>, vector<512x128xbf16>, vector<32x128xf32> -> vector<32x128xf32>
    %c0_4 = arith.constant 0 : index
    %c0_5 = arith.constant 0 : index
    %5 = vector.load %arg3[%c0_4, %c0_5] : memref<1x128xf32, #tpu.memory_space<vmem>>, vector<1x128xf32>
    %6 = vector.broadcast %5 : vector<1x128xf32> to vector<32x128xf32>
    %7 = arith.addf %4, %6 : vector<32x128xf32>
    %cst_6 = arith.constant 0.000000e+00 : f32
    %8 = vector.broadcast %cst_6 : f32 to vector<32x128xf32>
    %9 = arith.maximumf %7, %8 : vector<32x128xf32>
    %10 = arith.truncf %9 : vector<32x128xf32> to vector<32x128xbf16>
    %c0_7 = arith.constant 0 : index
    %c0_8 = arith.constant 0 : index
    %11 = vector.load %arg4[%c0_7, %c0_8] : memref<128x384xbf16, #tpu.memory_space<vmem>>, vector<128x384xbf16>
    %cst_9 = arith.constant dense<0.000000e+00> : vector<32x384xf32>
    %12 = tpu.matmul %10, %11, %cst_9 {dimension_numbers = #tpu.dot_dimension_numbers<[1], [0], [0], [1], [0, 0, 1, 1], [], []>} : vector<32x128xbf16>, vector<128x384xbf16>, vector<32x384xf32> -> vector<32x384xf32>
    %13 = vector.extract_strided_slice %12 {offsets = [0, 0], sizes = [32, 128], strides = [1, 1]} : vector<32x384xf32> to vector<32x128xf32>
    %14 = vector.extract_strided_slice %12 {offsets = [0, 128], sizes = [32, 128], strides = [1, 1]} : vector<32x384xf32> to vector<32x128xf32>
    %15 = vector.extract_strided_slice %12 {offsets = [0, 256], sizes = [32, 128], strides = [1, 1]} : vector<32x384xf32> to vector<32x128xf32>
    %cst_10 = arith.constant 0.000000e+00 : f32
    %16 = vector.broadcast %cst_10 : f32 to vector<1x128xf32>
    %17 = vector.extract_strided_slice %13 {offsets = [0, 0], sizes = [31, 128], strides = [1, 1]} : vector<32x128xf32> to vector<31x128xf32>
    %18 = tpu.concatenate %16, %17 in 0 : vector<1x128xf32>, vector<31x128xf32> -> vector<32x128xf32>
    %19 = vector.extract_strided_slice %15 {offsets = [1, 0], sizes = [31, 128], strides = [1, 1]} : vector<32x128xf32> to vector<31x128xf32>
    %20 = tpu.concatenate %19, %16 in 0 : vector<31x128xf32>, vector<1x128xf32> -> vector<32x128xf32>
    %21 = tpu.iota {dimensions = array<i32: 0>} : vector<32x1xi32>
    %c16_i32 = arith.constant 16 : i32
    %c0_i32 = arith.constant 0 : i32
    %22 = arith.cmpi eq, %c16_i32, %c0_i32 : i32
    %c1_i32 = arith.constant 1 : i32
    %23 = arith.select %22, %c1_i32, %c16_i32 : i32
    %24 = vector.broadcast %23 : i32 to vector<32x1xi32>
    %25 = arith.remsi %21, %24 : vector<32x1xi32>
    %c0_i32_11 = arith.constant 0 : i32
    %26 = vector.broadcast %c0_i32_11 : i32 to vector<32x1xi32>
    %27 = arith.cmpi ne, %25, %26 : vector<32x1xi32>
    %c0_i32_12 = arith.constant 0 : i32
    %28 = vector.broadcast %c0_i32_12 : i32 to vector<32x1xi32>
    %29 = arith.cmpi slt, %25, %28 : vector<32x1xi32>
    %c0_i32_13 = arith.constant 0 : i32
    %30 = arith.cmpi slt, %23, %c0_i32_13 : i32
    %31 = vector.broadcast %30 : i1 to vector<32x1xi1>
    %32 = vector.broadcast %31 : vector<32x1xi1> to vector<32x1xi1>
    %33 = arith.xori %29, %32 : vector<32x1xi1>
    %34 = arith.andi %33, %27 : vector<32x1xi1>
    %35 = vector.broadcast %23 : i32 to vector<32x1xi32>
    %36 = arith.addi %25, %35 : vector<32x1xi32>
    %37 = arith.select %34, %36, %25 : vector<32x1xi1>, vector<32x1xi32>
    %c0_i32_14 = arith.constant 0 : i32
    %38 = vector.broadcast %c0_i32_14 : i32 to vector<32x1xi32>
    %39 = arith.cmpi eq, %37, %38 : vector<32x1xi32>
    %cst_15 = arith.constant 0.000000e+00 : f32
    %40 = vector.shape_cast %39 : vector<32x1xi1> to vector<32x1xi1>
    %41 = vector.broadcast %40 : vector<32x1xi1> to vector<32x128xi1>
    %42 = vector.broadcast %cst_15 : f32 to vector<32x128xf32>
    %43 = arith.select %41, %42, %18 : vector<32x128xi1>, vector<32x128xf32>
    %c15_i32 = arith.constant 15 : i32
    %44 = vector.broadcast %c15_i32 : i32 to vector<32x1xi32>
    %45 = arith.cmpi eq, %37, %44 : vector<32x1xi32>
    %cst_16 = arith.constant 0.000000e+00 : f32
    %46 = vector.shape_cast %45 : vector<32x1xi1> to vector<32x1xi1>
    %47 = vector.broadcast %46 : vector<32x1xi1> to vector<32x128xi1>
    %48 = vector.broadcast %cst_16 : f32 to vector<32x128xf32>
    %49 = arith.select %47, %48, %20 : vector<32x128xi1>, vector<32x128xf32>
    %50 = arith.addf %43, %14 : vector<32x128xf32>
    %51 = arith.addf %50, %49 : vector<32x128xf32>
    %c0_17 = arith.constant 0 : index
    %c0_18 = arith.constant 0 : index
    %52 = vector.load %arg5[%c0_17, %c0_18] : memref<1x128xf32, #tpu.memory_space<vmem>>, vector<1x128xf32>
    %53 = vector.broadcast %52 : vector<1x128xf32> to vector<32x128xf32>
    %54 = arith.addf %51, %53 : vector<32x128xf32>
    %cst_19 = arith.constant 0.000000e+00 : f32
    %55 = vector.broadcast %cst_19 : f32 to vector<32x128xf32>
    %56 = arith.maximumf %54, %55 : vector<32x128xf32>
    %57 = arith.truncf %56 : vector<32x128xf32> to vector<32x128xbf16>
    %c0_20 = arith.constant 0 : index
    %c0_21 = arith.constant 0 : index
    %58 = vector.load %arg6[%c0_20, %c0_21] : memref<128x512xbf16, #tpu.memory_space<vmem>>, vector<128x512xbf16>
    %cst_22 = arith.constant dense<0.000000e+00> : vector<32x512xf32>
    %59 = tpu.matmul %57, %58, %cst_22 {dimension_numbers = #tpu.dot_dimension_numbers<[1], [0], [0], [1], [0, 0, 1, 1], [], []>} : vector<32x128xbf16>, vector<128x512xbf16>, vector<32x512xf32> -> vector<32x512xf32>
    %c0_23 = arith.constant 0 : index
    %c0_24 = arith.constant 0 : index
    %60 = vector.load %arg7[%c0_23, %c0_24] : memref<1x512xf32, #tpu.memory_space<vmem>>, vector<1x512xf32>
    %61 = vector.broadcast %60 : vector<1x512xf32> to vector<32x512xf32>
    %62 = arith.addf %59, %61 : vector<32x512xf32>
    %c0_25 = arith.constant 0 : index
    %c0_26 = arith.constant 0 : index
    %c0_27 = arith.constant 0 : index
    %63 = vector.load %arg1[%c0_25, %c0_26, %c0_27] : memref<2x16x512xf32, #tpu.memory_space<vmem>>, vector<2x16x512xf32>
    %64 = vector.shape_cast %63 : vector<2x16x512xf32> to vector<32x512xf32>
    %65 = arith.addf %64, %62 : vector<32x512xf32>
    %cst_28 = arith.constant 0.000000e+00 : f32
    %66 = vector.broadcast %cst_28 : f32 to vector<32x512xf32>
    %67 = arith.maximumf %65, %66 : vector<32x512xf32>
    %68 = vector.shape_cast %67 : vector<32x512xf32> to vector<2x16x512xf32>
    %c0_29 = arith.constant 0 : index
    %c0_30 = arith.constant 0 : index
    %c0_31 = arith.constant 0 : index
    %69 = vector.load %arg8[%c0_29, %c0_30, %c0_31] : memref<2x16x512xf32, #tpu.memory_space<vmem>>, vector<2x16x512xf32>
    tpu.vector_store %arg8[%c0_29, %c0_30, %c0_31], %68 {strides = array<i32>} : memref<2x16x512xf32, #tpu.memory_space<vmem>>, vector<2x16x512xf32>,
    return
  }
  func.func @transform_0(%arg0: i32) -> (i32, i32, i32) {
    %c0_i32 = arith.constant 0 : i32
    %c0_i32_0 = arith.constant 0 : i32
    %c0_i32_1 = arith.constant 0 : i32
    return %arg0, %c0_i32, %c0_i32_0 : i32, i32, i32
  }
  func.func @transform_1(%arg0: i32) -> (i32, i32) {
    %c0_i32 = arith.constant 0 : i32
    %c0_i32_0 = arith.constant 0 : i32
    %c0_i32_1 = arith.constant 0 : i32
    return %c0_i32, %c0_i32_0 : i32, i32
  }
  func.func @transform_2(%arg0: i32) -> (i32, i32) {
    %c0_i32 = arith.constant 0 : i32
    %c0_i32_0 = arith.constant 0 : i32
    %c0_i32_1 = arith.constant 0 : i32
    return %c0_i32, %c0_i32_0 : i32, i32
  }
  func.func @transform_3(%arg0: i32) -> (i32, i32) {
    %c0_i32 = arith.constant 0 : i32
    %c0_i32_0 = arith.constant 0 : i32
    %c0_i32_1 = arith.constant 0 : i32
    return %c0_i32, %c0_i32_0 : i32, i32
  }
  func.func @transform_4(%arg0: i32) -> (i32, i32) {
    %c0_i32 = arith.constant 0 : i32
    %c0_i32_0 = arith.constant 0 : i32
    %c0_i32_1 = arith.constant 0 : i32
    return %c0_i32, %c0_i32_0 : i32, i32
  }
  func.func @transform_5(%arg0: i32) -> (i32, i32) {
    %c0_i32 = arith.constant 0 : i32
    %c0_i32_0 = arith.constant 0 : i32
    %c0_i32_1 = arith.constant 0 : i32
    return %c0_i32, %c0_i32_0 : i32, i32
  }
  func.func @transform_6(%arg0: i32) -> (i32, i32) {
    %c0_i32 = arith.constant 0 : i32
    %c0_i32_0 = arith.constant 0 : i32
    %c0_i32_1 = arith.constant 0 : i32
    return %c0_i32, %c0_i32_0 : i32, i32
  }
  func.func @transform_7(%arg0: i32) -> (i32, i32, i32) {
    %c0_i32 = arith.constant 0 : i32
    %c0_i32_0 = arith.constant 0 : i32
    %c0_i32_1 = arith.constant 0 : i32
    return %arg0, %c0_i32, %c0_i32_0 : i32, i32, i32
  }
}

</mosaic_0001>

<bundles_post_ra>
// kernel: tpu_custom_call.1
= control target key start
LH: loop header
LB: loop body
LE: loop exit
PB: predicated region body
PF: predicated region fallthrough
CT: control target
= control target key end

     0   :  { %12 = vsyncpa [#allocation3], 0  ;;  %s1885_s0 = inlined_call_operand.hbm [shape: f32[2,16,512], index: 0, kind: input, shape index: {}]   ;;  %s1886_s1 = inlined_call_operand.hbm [shape: bf16[512,128], index: 1, kind: input, shape index: {}]   ;;  %s1887_s2 = inlined_call_operand.vmem [shape: f32[1,128], index: 2, kind: input, shape index: {}]   ;;  %s1888_s3 = inlined_call_operand.hbm [shape: bf16[128,384], index: 3, kind: input, shape index: {}]   ;;  %s1889_s4 = inlined_call_operand.vmem [shape: f32[1,128], index: 4, kind: input, shape index: {}]   ;;  %s1890_s5 = inlined_call_operand.hbm [shape: bf16[128,512], index: 5, kind: input, shape index: {}]   ;;  %s1891_s6 = inlined_call_operand.vmem [shape: f32[1,512], index: 6, kind: input, shape index: {}]   ;;  %s1892_s7 = inlined_call_operand.hbm [shape: f32[2,16,512], index: 7, kind: output, shape index: {}]  }
   0x1   :  { %13 = vsyncpa [#allocation6], 0 }
   0x2   :  { %14 = vsyncpa [#allocation9], 0 }
   0x3   :  { %15 = vsyncpa [#allocation4], 0  ;;  %s1677_s24 = smov [#allocation5]  }
   0x4   :  { %s33_s25 = sshll.u32 %s1677_s24, 4  ;;  %s34_s25 = int_to_ptr.vmem [resolvable:$true] %s33_s25 }
   0x5   :  { %s1577_s26 = scalar_lea.vmem %s34_s25, 4096  ;;  %p1582_p1 = scmp.lt.s32.totalorder %s34_s25, %s34_s25 }
   0x6   :  { %p1578_p0 = scmp.ne.s32.totalorder %s34_s25, %s1577_s26  ;;  %p1583_p2 = scmp.lt.s32.totalorder %s1577_s26, %s1577_s26 }
   0x8   :  { %p1584_p3 = por %p1583_p2, %p1582_p1 }
   0xa   :  { %p1585_p4 = pnand %p1584_p3, %p1578_p0 }
   0xc   :  { %1588 = shalt.err (!%p1585_p4)
}
   0xd   :  { %s1678_s27 = smov 64   ;;  %s1679_s28 = smov 4  }
   0xe   :  { %39 = dma.hbm_to_vmem [thread:$0]  %s1886_s1, 4096, %s34_s25, [#allocation6], %s1678_s27, %s1678_s27, %s1679_s28  }
   0xf   :  { %s1680_s8 = smov [#allocation2]  }
  0x10   :  { %s21_s9 = sshll.u32 %s1680_s8, 4  ;;  %s22_s9 = int_to_ptr.vmem [resolvable:$true] %s21_s9 }
  0x11   :  { %s1597_s10 = scalar_lea.vmem %s22_s9, 2048  ;;  %p1602_p6 = scmp.lt.s32.totalorder %s22_s9, %s22_s9 }
  0x12   :  { %p1598_p5 = scmp.ne.s32.totalorder %s22_s9, %s1597_s10  ;;  %p1603_p7 = scmp.lt.s32.totalorder %s1597_s10, %s1597_s10 }
  0x14   :  { %p1604_p8 = por %p1603_p7, %p1602_p6 }
  0x16   :  { %p1605_p9 = pnand %p1604_p8, %p1598_p5 }
  0x18   :  { %1608 = shalt.err (!%p1605_p9)
}
  0x19   :  { %s1681_s11 = smov 512   ;;  %s1682_s12 = smov 32  }
  0x1a   :  { %27 = dma.hbm_to_vmem [thread:$0]  %s1885_s0, 2048, %s22_s9, [#allocation3], %s1681_s11, %s1681_s11, %s1682_s12  }
  0x1b   :  { %s1683_s1 = smov [#allocation7]  }
  0x1c   :  { %s47_s15 = sshll.u32 %s1683_s1, 4  ;;  %s48_s15 = int_to_ptr.vmem [resolvable:$true] %s47_s15 }
  0x1d   :  { %s1617_s16 = scalar_lea.vmem %s48_s15, 3072  ;;  %p1622_p11 = scmp.lt.s32.totalorder %s48_s15, %s48_s15 }
  0x1e   :  { %p1618_p10 = scmp.ne.s32.totalorder %s48_s15, %s1617_s16  ;;  %p1623_p12 = scmp.lt.s32.totalorder %s1617_s16, %s1617_s16 }
  0x20   :  { %p1624_p13 = por %p1623_p12, %p1622_p11 }
  0x22   :  { %p1625_p0 = pnand %p1624_p13, %p1618_p10 }
  0x24   :  { %1628 = shalt.err (!%p1625_p0)
}
  0x25   :  { %s1684_s17 = smov 192   ;;  %s1685_s18 = smov 12  }
  0x26   :  { %53 = dma.hbm_to_vmem [thread:$0]  %s1888_s3, 3072, %s48_s15, [#allocation6], %s1684_s17, %s1684_s17, %s1685_s18  }
  0x27   :  { %s1686_s21 = smov [#allocation8]  }
  0x28   :  { %s61_s22 = sshll.u32 %s1686_s21, 4  ;;  %s62_s22 = int_to_ptr.vmem [resolvable:$true] %s61_s22 }
  0x29   :  { %s1637_s0 = scalar_lea.vmem %s62_s22, 4096  ;;  %p1642_p2 = scmp.lt.s32.totalorder %s62_s22, %s62_s22 }
  0x2a   :  { %p1638_p1 = scmp.ne.s32.totalorder %s62_s22, %s1637_s0  ;;  %p1643_p3 = scmp.lt.s32.totalorder %s1637_s0, %s1637_s0 }
  0x2c   :  { %p1644_p4 = por %p1643_p3, %p1642_p2 }
  0x2e   :  { %p1645_p5 = pnand %p1644_p4, %p1638_p1 }
  0x30   :  { %1648 = shalt.err (!%p1645_p5)
}
  0x31   :  { %s1687_s23 = smov 256   ;;  %s1688_s24 = smov 16  }
  0x32   :  { %67 = dma.hbm_to_vmem [thread:$0]  %s1890_s5, 4096, %s62_s22, [#allocation9], %s1687_s23, %s1687_s23, %s1688_s24  }
  0x33   :  { %1669 = dma.done.wait [#allocation3], 2048  }
  0x34   :  { %1670 = vsyncadd [#allocation3], 4294965248 }
  0x35   :  { %1671 = dma.done.wait [#allocation6], 7168  }
  0x36   :  { %1672 = vsyncadd [#allocation6], 4294960128 }
  0x37   :  { %1673 = dma.done.wait [#allocation9], 4096  }
  0x38   :  { %1674 = vsyncadd [#allocation9], 4294963200  ;;  %v1457_v0 = vld [vmem:[#allocation5 + $0x78] sm:$0xff]   ;;  %v1461_v4 = vld [vmem:[#allocation5 + $0x70] sm:$0xff]   ;;  %vm740_vm0 = vcmask 1040384   ;;  %vm757_vm3 = vcmask 1046528  }
  0x39   :  { %v1458_v1 = vld [vmem:[#allocation5 + $0xf8] sm:$0xff]   ;;  %1357 = vmatprep.subr.bf16.mxu0 %v1457_v0  ;;  %v1462_v5 = vld [vmem:[#allocation5 + $0xf0] sm:$0xff]   ;;  %v1465_v8 = vld [vmem:[#allocation5 + $0x68] sm:$0xff]  }
  0x3a   :  { %v1459_v2 = vld [vmem:[#allocation5 + $0x38] sm:$0xff]   ;;  %1385 = vmatprep.subr.bf16.mxu1 %v1458_v1  ;;  %v1463_v6 = vld [vmem:[#allocation5 + $0x30] sm:$0xff]   ;;  %v1466_v9 = vld [vmem:[#allocation5 + $0xe8] sm:$0xff]  }
  0x3b   :  { %v1460_v3 = vld [vmem:[#allocation5 + $0xb8] sm:$0xff]   ;;  %1358 = vmatpush3.bf16.msra.mxu0 %v1459_v2  ;;  %v1464_v7 = vld [vmem:[#allocation5 + $0xb0] sm:$0xff]   ;;  %v1467_v10 = vld [vmem:[#allocation5 + $0x28] sm:$0xff]  }
  0x3c   :  { %1386 = vmatpush3.bf16.msra.mxu1 %v1460_v3  ;;  %1359 = vmatprep.subr.bf16.mxu0 %v1461_v4  ;;  %v1468_v11 = vld [vmem:[#allocation5 + $0xa8] sm:$0xff]   ;;  %v1469_v12 = vld [vmem:[#allocation5 + $0x60] sm:$0xff]   ;;  %v1473_v16 = vld [vmem:[#allocation5 + $0x58] sm:$0xff]  }
  0x3d   :  { %1387 = vmatprep.subr.bf16.mxu1 %v1462_v5  ;;  %v1470_v13 = vld [vmem:[#allocation5 + $0xe0] sm:$0xff]   ;;  %v1474_v17 = vld [vmem:[#allocation5 + $0xd8] sm:$0xff]   ;;  %v1477_v20 = vld [vmem:[#allocation5 + $0x50] sm:$0xff]  }
  0x3e   :  { %v1471_v14 = vld [vmem:[#allocation5 + $0x20] sm:$0xff]   ;;  %v1475_v18 = vld [vmem:[#allocation5 + $0x18] sm:$0xff]   ;;  %v1478_v21 = vld [vmem:[#allocation5 + $0xd0] sm:$0xff]  }
  0x3f   :  { %1360 = vmatpush3.bf16.msra.mxu0 %v1463_v6  ;;  %v1472_v15 = vld [vmem:[#allocation5 + $0xa0] sm:$0xff]   ;;  %v1476_v19 = vld [vmem:[#allocation5 + $0x98] sm:$0xff]   ;;  %v1479_v22 = vld [vmem:[#allocation5 + $0x10] sm:$0xff]  }
  0x40   :  { %1388 = vmatpush3.bf16.msra.mxu1 %v1464_v7  ;;  %1361 = vmatprep.subr.bf16.mxu0 %v1465_v8  ;;  %v1480_v23 = vld [vmem:[#allocation5 + $0x90] sm:$0xff]   ;;  %v1481_v24 = vld [vmem:[#allocation5 + $0x48] sm:$0xff]   ;;  %v1485_v28 = vld [vmem:[#allocation5 + $0x40] sm:$0xff]  }
  0x41   :  { %1389 = vmatprep.subr.bf16.mxu1 %v1466_v9  ;;  %v1482_v25 = vld [vmem:[#allocation5 + $0xc8] sm:$0xff]   ;;  %v1486_v29 = vld [vmem:[#allocation5 + $0xc0] sm:$0xff]   ;;  %v1750_v34 = vld [vmem:[#allocation2 + $0x18] sm:$0xff] }
  0x42   :  { %v1483_v26 = vld [vmem:[#allocation5 + $0x8] sm:$0xff]   ;;  %v1487_v30 = vld [vmem:[#allocation5] sm:$0xff]   ;;  %v1754_v36 = vld [vmem:[#allocation2 + $0x38] sm:$0xff] }
  0x43   :  { %1362 = vmatpush3.bf16.msra.mxu0 %v1467_v10  ;;  %v1484_v27 = vld [vmem:[#allocation5 + $0x88] sm:$0xff]   ;;  %v1488_v31 = vld [vmem:[#allocation5 + $0x80] sm:$0xff]   ;;  %v102_v39 = vpack.c.bf16 %v1754_v36, %v1750_v34  ;;  %v1764_v41 = vld [vmem:[#allocation2 + $0x10] sm:$0xff] }
  0x44   :  { %1390 = vmatpush3.bf16.msra.mxu1 %v1468_v11  ;;  %1363 = vmatprep.subr.bf16.mxu0 %v1469_v12  ;;  %v1746_v32 = vld [vmem:[#allocation2 + $0x8] sm:$0xff]  ;;  %v1756_v37 = vld [vmem:[#allocation2] sm:$0xff]  ;;  %v1766_v42 = vld [vmem:[#allocation2 + $0x30] sm:$0xff] }
  0x45   :  { %1391 = vmatprep.subr.bf16.mxu1 %v1470_v13  ;;  %v1748_v33 = vld [vmem:[#allocation2 + $0x28] sm:$0xff]  ;;  %v1758_v38 = vld [vmem:[#allocation2 + $0x20] sm:$0xff]  ;;  %v101_v44 = vpack.c.bf16 %v1766_v42, %v1764_v41  ;;  %v1774_v46 = vld [vmem:[#allocation2 + $0x58] sm:$0xff]  ;;  %451 = vmatprep.mubr.bf16.mxu1 %v102_v39 }
  0x46   :  { %v100_v35 = vpack.c.bf16 %v1748_v33, %v1746_v32  ;;  %v99_v40 = vpack.c.bf16 %v1758_v38, %v1756_v37  ;;  %v1768_v43 = vld [vmem:[#allocation2 + $0x48] sm:$0xff]  ;;  %v1776_v47 = vld [vmem:[#allocation2 + $0x78] sm:$0xff]  ;;  %v1782_v50 = vld [vmem:[#allocation2 + $0x40] sm:$0xff] }
  0x47   :  { %1364 = vmatpush3.bf16.msra.mxu0 %v1471_v14  ;;  %v1772_v45 = vld [vmem:[#allocation2 + $0x68] sm:$0xff]  ;;  %v106_v49 = vpack.c.bf16 %v1776_v47, %v1774_v46  ;;  %v1784_v51 = vld [vmem:[#allocation2 + $0x60] sm:$0xff]  ;;  %v1786_v52 = vld [vmem:[#allocation2 + $0x50] sm:$0xff] }
  0x48   :  { %1392 = vmatpush3.bf16.msra.mxu1 %v1472_v15  ;;  %1365 = vmatprep.subr.bf16.mxu0 %v1473_v16  ;;  %v104_v48 = vpack.c.bf16 %v1772_v45, %v1768_v43  ;;  %v1788_v53 = vld [vmem:[#allocation2 + $0x70] sm:$0xff]  ;;  %v1491_v55 = vld [vmem:[#allocation7 + $0xac] ss:$12 sps:$4 sm:$0xff]   ;;  %v103_v57 = vpack.c.bf16 %v1784_v51, %v1782_v50  ;;  %v1497_v60 = vld [vmem:[#allocation7 + $0x7c] ss:$12 sps:$4 sm:$0xff]   ;;  %v1689_v15 = vmov 0  }
  0x49   :  { %1393 = vmatprep.subr.bf16.mxu1 %v1474_v17  ;;  %402 = vmatprep.mubr.bf16.mxu0 %v100_v35  ;;  %v1489_v54 = vld [vmem:[#allocation7 + $0xa8] ss:$12 sps:$4 sm:$0xff]   ;;  %v1492_v58 = vld [vmem:[#allocation7 + $0x90] ss:$12 sps:$4 sm:$0xff]   ;;  %v105_v59 = vpack.c.bf16 %v1788_v53, %v1786_v52  ;;  %v1495_v62 = vld [vmem:[#allocation7 + $0x78] ss:$12 sps:$4 sm:$0xff]  }
  0x4a   :  { %v1494_v56 = vld [vmem:[#allocation7 + $0x94] ss:$12 sps:$4 sm:$0xff]   ;;  %v1498_v61 = vld [vmem:[#allocation7 + $0xb0] ss:$12 sps:$4 sm:$0xff]   ;;  %v1502_v0 = vld [vmem:[#allocation7 + $0x98] ss:$12 sps:$4 sm:$0xff]  }
  0x4b   :  { %1366 = vmatpush3.bf16.msra.mxu0 %v1475_v18  ;;  %v1501_v63 = vld [vmem:[#allocation7 + $0x64] ss:$12 sps:$4 sm:$0xff]   ;;  %v1499_v1 = vld [vmem:[#allocation7 + $0x60] ss:$12 sps:$4 sm:$0xff]   ;;  %v1503_v4 = vld [vmem:[#allocation7 + $0x48] ss:$12 sps:$4 sm:$0xff]  }
  0x4c   :  { %1394 = vmatpush3.bf16.msra.mxu1 %v1476_v19  ;;  %1367 = vmatprep.subr.bf16.mxu0 %v1477_v20  ;;  %v1505_v2 = vld [vmem:[#allocation7 + $0x4c] ss:$12 sps:$4 sm:$0xff]   ;;  %v1509_v5 = vld [vmem:[#allocation7 + $0x34] ss:$12 sps:$4 sm:$0xff]   ;;  %v1507_v7 = vld [vmem:[#allocation7 + $0x30] ss:$12 sps:$4 sm:$0xff]  }
  0x4d   :  { %1395 = vmatprep.subr.bf16.mxu1 %v1478_v21  ;;  %v1506_v3 = vld [vmem:[#allocation7 + $0x80] ss:$12 sps:$4 sm:$0xff]   ;;  %v1510_v6 = vld [vmem:[#allocation7 + $0x68] ss:$12 sps:$4 sm:$0xff]   ;;  %v1514_v9 = vld [vmem:[#allocation7 + $0x50] ss:$12 sps:$4 sm:$0xff]  }
  0x4e   :  { %v1513_v8 = vld [vmem:[#allocation7 + $0x1c] ss:$12 sps:$4 sm:$0xff]   ;;  %v1511_v10 = vld [vmem:[#allocation7 + $0x18] ss:$12 sps:$4 sm:$0xff]   ;;  %v1515_v13 = vld [vmem:[#allocation7] ss:$12 sps:$4 sm:$0xff]  }
  0x4f   :  { %1368 = vmatpush3.bf16.msra.mxu0 %v1479_v22  ;;  %v1517_v11 = vld [vmem:[#allocation7 + $0x4] ss:$12 sps:$4 sm:$0xff]   ;;  %v1519_v14 = vld [vmem:[#allocation7 + $0x20] ss:$12 sps:$4 sm:$0xff]   ;;  %v1520_v16 = vld [vmem:[#allocation7 + $0x8] ss:$12 sps:$4 sm:$0xff]  }
  0x50   :  { %1396 = vmatpush3.bf16.msra.mxu1 %v1480_v23  ;;  %1369 = vmatprep.subr.bf16.mxu0 %v1481_v24  ;;  %v1518_v12 = vld [vmem:[#allocation7 + $0x38] ss:$12 sps:$4 sm:$0xff]   ;;  %v1526_v18 = vld [vmem:[#allocation8 + $0xec] ss:$16 sps:$4 sm:$0xff]   ;;  %v1267_v21 = vld [vmem:[%s1887_s2] ss:$0 sm:$0xff] }
  0x51   :  { %1397 = vmatprep.subr.bf16.mxu1 %v1482_v25  ;;  %v1523_v17 = vld [vmem:[#allocation8 + $0xe4] ss:$16 sps:$4 sm:$0xff]  }
  0x53   :  { %1370 = vmatpush3.bf16.msra.mxu0 %v1483_v26 }
  0x54   :  { %1398 = vmatpush3.bf16.msra.mxu1 %v1484_v27  ;;  %1371 = vmatprep.subr.bf16.mxu0 %v1485_v28 }
  0x55   :  { %1399 = vmatprep.subr.bf16.mxu1 %v1486_v29 }
  0x57   :  { %1372 = vmatpush3.bf16.msra.mxu0 %v1487_v30 }
  0x58   :  { %1400 = vmatpush3.bf16.msra.mxu1 %v1488_v31  ;;  %634 = vmatprep.subr.bf16.mxu0 %v1491_v55 }
  0x59   :  { %1423 = vmatprep.subr.bf16.mxu1 %v1498_v61 }
  0x5a   :  { %403 = vmatmul.mubr.bf16.vlgmr.msra.gmra.mxu0 %v99_v40 }
  0x5b   :  { %452 = vmatmul.mubr.bf16.vlgmr.msra.gmra.mxu1 %v101_v44  ;;  %410 = vmatprep.mubr.bf16.mxu0 %v104_v48 }
  0x5c   :  { %459 = vmatprep.mubr.bf16.mxu1 %v106_v49  ;;  %635 = vmatpush1.bf16.msra.mxu0 %v1489_v54 }
  0x5d   :  { %636 = vmatprep.subr.bf16.mxu0 %v1494_v56  ;;  %1424 = vmatpush3.bf16.msra.mxu1 %v1498_v61 }
  0x5e   :  { %1425 = vmatprep.subr.bf16.mxu1 %v1502_v0 }
  0x60   :  { %637 = vmatpush1.bf16.msra.mxu0 %v1492_v58 }
  0x61   :  { %638 = vmatprep.subr.bf16.mxu0 %v1497_v60  ;;  %1426 = vmatpush3.bf16.msra.mxu1 %v1502_v0 }
  0x62   :  { %411 = vmatmul.mubr.bf16.gmra.mxu0 %v103_v57  ;;  %1427 = vmatprep.subr.bf16.mxu1 %v1506_v3 }
  0x63   :  { %460 = vmatmul.mubr.bf16.gmra.mxu1 %v105_v59  ;;  %666 = vmatprep.mubr.bf16.mxu0 %v1689_v15 }
  0x64   :  { %639 = vmatpush1.bf16.msra.mxu0 %v1495_v62 }
  0x65   :  { %640 = vmatprep.subr.bf16.mxu0 %v1501_v63  ;;  %1428 = vmatpush3.bf16.msra.mxu1 %v1506_v3  ;;  %v1521_v63 = vld [vmem:[#allocation8 + $0xe0] ss:$16 sps:$4 sm:$0xff]  }
  0x66   :  { %1429 = vmatprep.subr.bf16.mxu1 %v1510_v6 }
  0x68   :  { %641 = vmatpush1.bf16.msra.mxu0 %v1499_v1 }
  0x69   :  { %642 = vmatprep.subr.bf16.mxu0 %v1505_v2  ;;  %1430 = vmatpush3.bf16.msra.mxu1 %v1510_v6 }
  0x6a   :  { %1431 = vmatprep.subr.bf16.mxu1 %v1514_v9 }
  0x6c   :  { %643 = vmatpush1.bf16.msra.mxu0 %v1503_v4  ;;  %v1529_v4 = vld [vmem:[#allocation8 + $0xc4] ss:$16 sps:$4 sm:$0xff]  }
  0x6d   :  { %644 = vmatprep.subr.bf16.mxu0 %v1509_v5  ;;  %1432 = vmatpush3.bf16.msra.mxu1 %v1514_v9 }
  0x6e   :  { %1433 = vmatprep.subr.bf16.mxu1 %v1518_v12 }
  0x70   :  { %645 = vmatpush1.bf16.msra.mxu0 %v1507_v7 }
  0x71   :  { %646 = vmatprep.subr.bf16.mxu0 %v1513_v8  ;;  %1434 = vmatpush3.bf16.msra.mxu1 %v1518_v12  ;;  %v1527_v8 = vld [vmem:[#allocation8 + $0xc0] ss:$16 sps:$4 sm:$0xff]   ;;  %v1524_v12 = vld [vmem:[#allocation8 + $0xe8] ss:$16 sps:$4 sm:$0xff]  }
  0x72   :  { %1435 = vmatprep.subr.bf16.mxu1 %v1519_v14 }
  0x74   :  { %647 = vmatpush1.bf16.msra.mxu0 %v1511_v10 }
  0x75   :  { %648 = vmatprep.subr.bf16.mxu0 %v1517_v11  ;;  %1436 = vmatpush3.bf16.msra.mxu1 %v1519_v14  ;;  %v1532_v14 = vld [vmem:[#allocation8 + $0xcc] ss:$16 sps:$4 sm:$0xff]  }
  0x76   :  { %1437 = vmatprep.subr.bf16.mxu1 %v1520_v16 }
  0x78   :  { %649 = vmatpush1.bf16.msra.mxu0 %v1515_v13 }
  0x79   :  { %1438 = vmatpush3.bf16.msra.mxu1 %v1520_v16  ;;  %1094 = vmatprep.subr.bf16.mxu0 %v1523_v17  ;;  %v1530_v16 = vld [vmem:[#allocation8 + $0xc8] ss:$16 sps:$4 sm:$0xff]   ;;  %v1535_v17 = vld [vmem:[#allocation8 + $0xa4] ss:$16 sps:$4 sm:$0xff]  }
  0x7a   :  { %1147 = vmatprep.subr.bf16.mxu1 %v1526_v18  ;;  %v1538_v18 = vld [vmem:[#allocation8 + $0xac] ss:$16 sps:$4 sm:$0xff]  }
 0x11a   :  { %v1373_v19 = vpop.f32.mrf.mxu0 }
 0x11b   :  { %v1401_v20 = vpop.f32.mrf.mxu1 }
 0x11c   :  { %v1374_v22 = vpop.f32.mrf.mxu0 }
 0x11d   :  { %v1375_v23 = vadd.f32 %v1374_v22, %v1373_v19  ;;  %v1402_v24 = vpop.f32.mrf.mxu1  ;;  %v1533_v19 = vld [vmem:[#allocation8 + $0xa0] ss:$16 sps:$4 sm:$0xff]   ;;  %v1544_v22 = vld [vmem:[#allocation8 + $0x8c] ss:$16 sps:$4 sm:$0xff]  }
 0x11e   :  { %v1376_v25 = vpop.f32.mrf.mxu0  ;;  %v1403_v29 = vadd.f32 %v1402_v24, %v1401_v20  ;;  %v1536_v20 = vld [vmem:[#allocation8 + $0xa8] ss:$16 sps:$4 sm:$0xff]  }
 0x11f   :  { %v405_v26 = vadd.f32 %v1375_v23, %v1267_v21  ;;  %v1404_v27 = vpop.f32.mrf.mxu1  ;;  %v1539_v23 = vld [vmem:[#allocation8 + $0x80] ss:$16 sps:$4 sm:$0xff]   ;;  %v1542_v24 = vld [vmem:[#allocation8 + $0x88] ss:$16 sps:$4 sm:$0xff]  }
 0x120   :  { %v1377_v28 = vpop.f32.mrf.mxu0 }
 0x121   :  { %v1378_v30 = vadd.f32 %v1377_v28, %v1376_v25  ;;  %v1405_v31 = vpop.f32.mrf.mxu1  ;;  %v454_v39 = vadd.f32 %v1403_v29, %v405_v26  ;;  %v1547_v25 = vld [vmem:[#allocation8 + $0x64] ss:$16 sps:$4 sm:$0xff]   ;;  %v1550_v26 = vld [vmem:[#allocation8 + $0x6c] ss:$16 sps:$4 sm:$0xff]   ;;  %v1548_v28 = vld [vmem:[#allocation8 + $0x68] ss:$16 sps:$4 sm:$0xff]  }
 0x122   :  { %v1379_v35 = vpop.f32.mrf.mxu0  ;;  %v1406_v44 = vadd.f32 %v1405_v31, %v1404_v27  ;;  %v1545_v27 = vld [vmem:[#allocation8 + $0x60] ss:$16 sps:$4 sm:$0xff]   ;;  %v1553_v29 = vld [vmem:[#allocation8 + $0x44] ss:$16 sps:$4 sm:$0xff]  }
 0x123   :  { %v408_v40 = vadd.f32 %v1378_v30, %v1267_v21  ;;  %v1407_v48 = vpop.f32.mrf.mxu1  ;;  %v468_v58 = vmax.f32 %v454_v39, 0.0  ;;  %v1556_v30 = vld [vmem:[#allocation8 + $0x4c] ss:$16 sps:$4 sm:$0xff]   ;;  %v1551_v31 = vld [vmem:[#allocation8 + $0x40] ss:$16 sps:$4 sm:$0xff]  }
 0x124   :  { %v1380_v49 = vpop.f32.mrf.mxu0  ;;  %v1559_v39 = vld [vmem:[#allocation8 + $0x24] ss:$16 sps:$4 sm:$0xff]  }
 0x125   :  { %v457_v54 = vadd.f32 %v1406_v44, %v408_v40  ;;  %v1381_v55 = vadd.f32 %v1380_v49, %v1379_v35  ;;  %v1408_v56 = vpop.f32.mrf.mxu1  ;;  %v1554_v35 = vld [vmem:[#allocation8 + $0x48] ss:$16 sps:$4 sm:$0xff]   ;;  %v1557_v40 = vld [vmem:[#allocation8 + $0x20] ss:$16 sps:$4 sm:$0xff]   ;;  %v1565_v49 = vld [vmem:[#allocation8 + $0x4] ss:$16 sps:$4 sm:$0xff]  }
 0x126   :  { %v1382_v57 = vpop.f32.mrf.mxu0  ;;  %v1409_v1 = vadd.f32 %v1408_v56, %v1407_v48  ;;  %v1560_v44 = vld [vmem:[#allocation8 + $0x28] ss:$16 sps:$4 sm:$0xff]   ;;  %v1562_v48 = vld [vmem:[#allocation8 + $0x2c] ss:$16 sps:$4 sm:$0xff]  }
 0x127   :  { %v469_v59 = vmax.f32 %v457_v54, 0.0  ;;  %v413_v60 = vadd.f32 %v1381_v55, %v1267_v21  ;;  %v1410_v61 = vpop.f32.mrf.mxu1  ;;  %v1568_v54 = vld [vmem:[#allocation8 + $0xc] ss:$16 sps:$4 sm:$0xff]   ;;  %v1563_v55 = vld [vmem:[#allocation8] ss:$16 sps:$4 sm:$0xff]  }
 0x128   :  { %v1383_v62 = vpop.f32.mrf.mxu0  ;;  %v1566_v56 = vld [vmem:[#allocation8 + $0x8] ss:$16 sps:$4 sm:$0xff]  }
 0x129   :  { %v472_v0 = vpack.c.bf16 %v469_v59, %v468_v58  ;;  %v1384_v2 = vadd.f32 %v1383_v62, %v1382_v57  ;;  %v1411_v3 = vpop.f32.mrf.mxu1  ;;  %v462_v5 = vadd.f32 %v1409_v1, %v413_v60  ;;  %v770_v57 = vlaneseq }
 0x12a   :  { %v1412_v7 = vadd.f32 %v1411_v3, %v1410_v61 }
 0x12b   :  { %v416_v6 = vadd.f32 %v1384_v2, %v1267_v21  ;;  %667 = vmatmul.mubr.bf16.vlgmr.msra.gmra.mxu0 %v472_v0  ;;  %1439 = vmatprep.mubr.bf16.mxu1 %v472_v0  ;;  %v470_v10 = vmax.f32 %v462_v5, 0.0  ;;  %v1541_v21 = vld [vmem:[#allocation8 + $0x84] ss:$16 sps:$4 sm:$0xff]   ;;  %v1801_v59 = vshrl.u32 %v770_v57, 7 }
 0x12c   :  { %676 = vmatprep.mubr.bf16.mxu0 %v1689_v15  ;;  %1095 = vmatpush1.bf16.msra.mxu0 %v1521_v63 }
 0x12d   :  { %v465_v9 = vadd.f32 %v1412_v7, %v416_v6  ;;  %1096 = vmatprep.subr.bf16.mxu0 %v1529_v4  ;;  %v773_v62 = vadd.s32 16, %v1801_v59  ;;  %v779_v63 = vand.u32 15, %v1801_v59  ;;  %v774_v2 = vadd.s32 24, %v1801_v59 }
 0x12e   :  { %v772_v3 = vadd.s32 8, %v1801_v59 }
 0x12f   :  { %v471_v11 = vmax.f32 %v465_v9, 0.0  ;;  %v793_v6 = vand.u32 15, %v773_v62  ;;  %vm1807_vm1 = vcmp.eq.s32.totalorder %v779_v63, 0 }
 0x130   :  { %1097 = vmatpush1.bf16.msra.mxu0 %v1527_v8 }
 0x131   :  { %v473_v13 = vpack.c.bf16 %v471_v11, %v470_v10  ;;  %1098 = vmatprep.subr.bf16.mxu0 %v1535_v17  ;;  %vm1812_vm2 = vcmp.eq.s32.totalorder %v793_v6, 0 }
 0x133   :  { %677 = vmatmul.mubr.bf16.gmra.mxu0 %v473_v13  ;;  %1440 = vmatmul.mubr.bf16.vlgmr.msra.gmra.mxu1 %v473_v13  ;;  %v800_v13 = vand.u32 15, %v774_v2 }
 0x134   :  { %1148 = vmatpush1.bf16.msra.mxu1 %v1524_v12  ;;  %1126 = vmatprep.mubr.bf16.mxu0 %v1689_v15 }
 0x135   :  { %1149 = vmatprep.subr.bf16.mxu1 %v1532_v14  ;;  %1179 = vmatprep.mubr.bf16.mxu1 %v1689_v15  ;;  %v786_v14 = vand.u32 15, %v772_v3  ;;  %vm1820_vm4 = vcmp.eq.s32.totalorder %v800_v13, 15  ;;  %v912_v13 = vld [vmem:[%s1891_s6] sm:$0xf]  ;;  %s1690_s6 = smov [#allocation10]  }
 0x136   :  { %1099 = vmatpush1.bf16.msra.mxu0 %v1533_v19  ;;  %s1253_s29 = sshll.u32 %s1690_s6, 4  ;;  %s1254_s29 = int_to_ptr.vmem [resolvable:$true] %s1253_s29 }
 0x137   :  { %1100 = vmatprep.subr.bf16.mxu0 %v1541_v21  ;;  %vm1824_vm5 = vcmp.eq.s32.totalorder %v786_v14, 15  ;;  %v920_v14 = vsub.s32 1, %v1801_v59  ;;  %s1649_s30 = scalar_lea.vmem %s1254_s29, 2048  ;;  %p1654_p7 = scmp.lt.s32.totalorder %s1254_s29, %s1254_s29 }
 0x138   :  { %1150 = vmatpush1.bf16.msra.mxu1 %v1530_v16  ;;  %v928_v16 = vsub.s32 3, %v1801_v59  ;;  %p1650_p6 = scmp.ne.s32.totalorder %s1254_s29, %s1649_s30  ;;  %p1655_p8 = scmp.lt.s32.totalorder %s1649_s30, %s1649_s30 }
 0x139   :  { %1151 = vmatprep.subr.bf16.mxu1 %v1538_v18 }
 0x13a   :  { %1101 = vmatpush1.bf16.msra.mxu0 %v1539_v23  ;;  %p1656_p9 = por %p1655_p8, %p1654_p7 }
 0x13b   :  { %1102 = vmatprep.subr.bf16.mxu0 %v1547_v25 }
 0x13c   :  { %1152 = vmatpush1.bf16.msra.mxu1 %v1536_v20  ;;  %p1657_p10 = pnand %p1656_p9, %p1650_p6 }
 0x13d   :  { %1153 = vmatprep.subr.bf16.mxu1 %v1544_v22 }
 0x13e   :  { %1103 = vmatpush1.bf16.msra.mxu0 %v1545_v27 }
 0x13f   :  { %1104 = vmatprep.subr.bf16.mxu0 %v1553_v29 }
 0x140   :  { %1154 = vmatpush1.bf16.msra.mxu1 %v1542_v24 }
 0x141   :  { %1155 = vmatprep.subr.bf16.mxu1 %v1550_v26 }
 0x142   :  { %1105 = vmatpush1.bf16.msra.mxu0 %v1551_v31 }
 0x143   :  { %1106 = vmatprep.subr.bf16.mxu0 %v1559_v39 }
 0x144   :  { %1156 = vmatpush1.bf16.msra.mxu1 %v1548_v28 }
 0x145   :  { %1157 = vmatprep.subr.bf16.mxu1 %v1556_v30 }
 0x146   :  { %1107 = vmatpush1.bf16.msra.mxu0 %v1557_v40 }
 0x147   :  { %1108 = vmatprep.subr.bf16.mxu0 %v1565_v49 }
 0x148   :  { %1158 = vmatpush1.bf16.msra.mxu1 %v1554_v35 }
 0x149   :  { %1159 = vmatprep.subr.bf16.mxu1 %v1562_v48 }
 0x14a   :  { %1109 = vmatpush1.bf16.msra.mxu0 %v1563_v55 }
 0x14c   :  { %1160 = vmatpush1.bf16.msra.mxu1 %v1560_v44 }
 0x14d   :  { %1161 = vmatprep.subr.bf16.mxu1 %v1568_v54 }
 0x150   :  { %1162 = vmatpush1.bf16.msra.mxu1 %v1566_v56 }
 0x1eb   :  { %v668_v58 = vpop.f32.mrf.mxu0 }
 0x1ec   :  { %v741_v0 = vrot.slane %v668_v58, 7 }
 0x1ed   :  { %v670_v60 = vpop.f32.mrf.mxu0 }
 0x1ee   :  { %v752_v9 = vsel %vm740_vm0, 0.0, %v741_v0 }
 0x1ef   :  { %v672_v61 = vpop.f32.mrf.mxu0  ;;  %v835_v19 = vsel %vm1807_vm1, 0.0, %v752_v9 }
 0x1f0   :  { %v742_v10 = vrot.slane %v672_v61, 7  ;;  %v855_v39 = vadd.f32 %v835_v19, %v670_v60  ;;  %v1324_v60 = vld [vmem:[%s1889_s4] ss:$0 sm:$0xff]  ;;  %v1853_v19 = vrot.slane %v912_v13, %v928_v16 }
 0x1f1   :  { %v674_v1 = vpop.f32.mrf.mxu0 }
 0x1f2   :  { %v743_v23 = vsel %vm740_vm0, %v741_v0, %v742_v10 }
 0x1f3   :  { %v678_v4 = vpop.f32.mrf.mxu0  ;;  %v1441_v5 = vpop.f32.mrf.mxu1  ;;  %v856_v44 = vadd.f32 %v743_v23, %v674_v1 }
 0x1f4   :  { %v744_v8 = vrot.slane %v678_v4, 7  ;;  %v761_v24 = vrot.slane %v1441_v5, 1 }
 0x1f5   :  { %v680_v11 = vpop.f32.mrf.mxu0  ;;  %v721_v12 = vpop.f32.mrf.mxu1 }
 0x1f6   :  { %v745_v20 = vsel %vm740_vm0, %v742_v10, %v744_v8  ;;  %v758_v29 = vrot.slane %v721_v12, 1  ;;  %v924_v12 = vsub.s32 2, %v1801_v59 }
 0x1f7   :  { %v682_v17 = vpop.f32.mrf.mxu0  ;;  %v1442_v18 = vpop.f32.mrf.mxu1  ;;  %v837_v40 = vsel %vm1812_vm2, 0.0, %v745_v20 }
 0x1f8   :  { %v746_v21 = vrot.slane %v682_v17, 7  ;;  %v763_v22 = vrot.slane %v1442_v18, 1  ;;  %v857_v58 = vadd.f32 %v837_v40, %v680_v11  ;;  %v916_v11 = vsub.s32 0, %v1801_v59 }
 0x1f9   :  { %v684_v25 = vpop.f32.mrf.mxu0  ;;  %v724_v27 = vpop.f32.mrf.mxu1  ;;  %v925_v18 = vrot.slane %v912_v13, %v924_v12 }
 0x1fa   :  { %v769_v30 = vsel %vm757_vm3, %v763_v22, 0.0  ;;  %v747_v31 = vsel %vm740_vm0, %v744_v8, %v746_v21  ;;  %v759_v35 = vrot.slane %v724_v27, 1  ;;  %v764_v62 = vsel %vm757_vm3, %v761_v24, %v763_v22 }
 0x1fb   :  { %v858_v48 = vadd.f32 %v747_v31, %v684_v25  ;;  %v854_v55 = vsel %vm1820_vm4, 0.0, %v769_v30  ;;  %v861_v3 = vadd.f32 %v857_v58, %v764_v62  ;;  %v917_v17 = vrot.slane %v912_v13, %v916_v11 }
 0x1fc   :  { %v760_v49 = vsel %vm757_vm3, %v758_v29, %v759_v35  ;;  %v762_v54 = vsel %vm757_vm3, %v759_v35, %v761_v24 }
 0x1fd   :  { %v852_v56 = vsel %vm1824_vm5, 0.0, %v762_v54  ;;  %v859_v57 = vadd.f32 %v855_v39, %v760_v49  ;;  %v862_v0 = vadd.f32 %v858_v48, %v854_v55  ;;  %v872_v7 = vadd.f32 %v1324_v60, %v861_v3 }
 0x1fe   :  { %v860_v61 = vadd.f32 %v856_v44, %v852_v56 }
 0x1ff   :  { %v870_v63 = vadd.f32 %v1324_v60, %v859_v57  ;;  %v873_v5 = vadd.f32 %v1324_v60, %v862_v0  ;;  %v876_v9 = vmax.f32 %v872_v7, 0.0 }
 0x200   :  { %v871_v1 = vadd.f32 %v1324_v60, %v860_v61 }
 0x201   :  { %v874_v2 = vmax.f32 %v870_v63, 0.0  ;;  %v877_v8 = vmax.f32 %v873_v5, 0.0 }
 0x202   :  { %v875_v4 = vmax.f32 %v871_v1, 0.0 }
 0x203   :  { %v879_v10 = vpack.c.bf16 %v877_v8, %v876_v9 }
 0x204   :  { %v878_v6 = vpack.c.bf16 %v875_v4, %v874_v2 }
 0x206   :  { %1127 = vmatmul.mubr.bf16.vlgmr.msra.gmra.mxu0 %v878_v6  ;;  %1180 = vmatmul.mubr.bf16.vlgmr.msra.gmra.mxu1 %v878_v6 }
 0x207   :  { %1136 = vmatprep.mubr.bf16.mxu0 %v1689_v15  ;;  %1189 = vmatprep.mubr.bf16.mxu1 %v1689_v15  ;;  %v1851_v15 = vrot.slane %v912_v13, %v920_v14 }
 0x20e   :  { %1137 = vmatmul.mubr.bf16.gmra.mxu0 %v879_v10  ;;  %1190 = vmatmul.mubr.bf16.gmra.mxu1 %v879_v10 }
 0x2c6   :  { %v1128_v20 = vpop.f32.mrf.mxu0  ;;  %v1181_v21 = vpop.f32.mrf.mxu1 }
 0x2c7   :  { %v1129_v22 = vadd.f32 %v1128_v20, %v917_v17  ;;  %v1182_v23 = vadd.f32 %v1181_v21, %v925_v18 }
 0x2c8   :  { %v1130_v24 = vpop.f32.mrf.mxu0  ;;  %v1183_v25 = vpop.f32.mrf.mxu1 }
 0x2c9   :  { %v1200_v26 = vadd.f32 %v1129_v22, %v1756_v37  ;;  %v1202_v27 = vadd.f32 %v1182_v23, %v1764_v41  ;;  %v1131_v28 = vadd.f32 %v1130_v24, %v1851_v15  ;;  %v1184_v59 = vadd.f32 %v1183_v25, %v1853_v19 }
 0x2ca   :  { %v1132_v29 = vpop.f32.mrf.mxu0  ;;  %v1185_v30 = vpop.f32.mrf.mxu1 }
 0x2cb   :  { %v1216_v31 = vmax.f32 %v1200_v26, 0.0  ;;  %v1218_v35 = vmax.f32 %v1202_v27, 0.0  ;;  %v1201_v39 = vadd.f32 %v1131_v28, %v1746_v32  ;;  %v1203_v40 = vadd.f32 %v1184_v59, %v1750_v34 }
 0x2cc   :  { %v1133_v44 = vadd.f32 %v1132_v29, %v917_v17  ;;  %v1186_v48 = vadd.f32 %v1185_v30, %v925_v18  ;;  %v1134_v49 = vpop.f32.mrf.mxu0  ;;  %v1187_v54 = vpop.f32.mrf.mxu1 }
 0x2cd   :  { %1232 = vst [vmem:[#allocation10] sm:$0xff] %v1216_v31  ;;  %1234 = vst [vmem:[#allocation10 + $0x10] sm:$0xff] %v1218_v35  ;;  %v1217_v37 = vmax.f32 %v1201_v39, 0.0  ;;  %v1219_v41 = vmax.f32 %v1203_v40, 0.0  ;;  %v1135_v55 = vadd.f32 %v1134_v49, %v1851_v15  ;;  %v1188_v56 = vadd.f32 %v1187_v54, %v1853_v19 }
 0x2ce   :  { %v1204_v57 = vadd.f32 %v1133_v44, %v1758_v38  ;;  %v1206_v58 = vadd.f32 %v1186_v48, %v1766_v42  ;;  %v1138_v60 = vpop.f32.mrf.mxu0  ;;  %v1191_v32 = vpop.f32.mrf.mxu1 }
 0x2cf   :  { %1233 = vst [vmem:[#allocation10 + $0x8] sm:$0xff] %v1217_v37  ;;  %1235 = vst [vmem:[#allocation10 + $0x18] sm:$0xff] %v1219_v41  ;;  %v1205_v34 = vadd.f32 %v1135_v55, %v1748_v33  ;;  %v1207_v61 = vadd.f32 %v1188_v56, %v1754_v36  ;;  %v1139_v62 = vadd.f32 %v1138_v60, %v917_v17 }
 0x2d0   :  { %v1192_v63 = vadd.f32 %v1191_v32, %v925_v18  ;;  %v1220_v0 = vmax.f32 %v1204_v57, 0.0  ;;  %v1222_v1 = vmax.f32 %v1206_v58, 0.0  ;;  %v1140_v2 = vpop.f32.mrf.mxu0  ;;  %v1193_v3 = vpop.f32.mrf.mxu1 }
 0x2d1   :  { %v1221_v4 = vmax.f32 %v1205_v34, 0.0  ;;  %v1223_v5 = vmax.f32 %v1207_v61, 0.0  ;;  %v1208_v38 = vadd.f32 %v1139_v62, %v1782_v50  ;;  %v1141_v6 = vadd.f32 %v1140_v2, %v1851_v15 }
 0x2d2   :  { %v1210_v42 = vadd.f32 %v1192_v63, %v1786_v52  ;;  %1236 = vst [vmem:[#allocation10 + $0x20] sm:$0xff] %v1220_v0  ;;  %1238 = vst [vmem:[#allocation10 + $0x30] sm:$0xff] %v1222_v1  ;;  %v1194_v33 = vadd.f32 %v1193_v3, %v1853_v19  ;;  %v1142_v7 = vpop.f32.mrf.mxu0  ;;  %v1195_v36 = vpop.f32.mrf.mxu1 }
 0x2d3   :  { %1237 = vst [vmem:[#allocation10 + $0x28] sm:$0xff] %v1221_v4  ;;  %1239 = vst [vmem:[#allocation10 + $0x38] sm:$0xff] %v1223_v5  ;;  %v1224_v8 = vmax.f32 %v1208_v38, 0.0  ;;  %v1143_v10 = vadd.f32 %v1142_v7, %v917_v17  ;;  %v1196_v11 = vadd.f32 %v1195_v36, %v925_v18  ;;  %v1209_v12 = vadd.f32 %v1141_v6, %v1768_v43 }
 0x2d4   :  { %v1226_v9 = vmax.f32 %v1210_v42, 0.0  ;;  %v1211_v50 = vadd.f32 %v1194_v33, %v1774_v46  ;;  %v1144_v13 = vpop.f32.mrf.mxu0  ;;  %v1197_v52 = vpop.f32.mrf.mxu1 }
 0x2d5   :  { %1240 = vst [vmem:[#allocation10 + $0x40] sm:$0xff] %v1224_v8  ;;  %v1212_v14 = vadd.f32 %v1143_v10, %v1784_v51  ;;  %v1214_v16 = vadd.f32 %v1196_v11, %v1788_v53  ;;  %v1145_v20 = vadd.f32 %v1144_v13, %v1851_v15  ;;  %v1198_v21 = vadd.f32 %v1197_v52, %v1853_v19 }
 0x2d6   :  { %1242 = vst [vmem:[#allocation10 + $0x50] sm:$0xff] %v1226_v9  ;;  %v1225_v22 = vmax.f32 %v1209_v12, 0.0  ;;  %v1227_v23 = vmax.f32 %v1211_v50, 0.0 }
 0x2d7   :  { %v1228_v17 = vmax.f32 %v1212_v14, 0.0  ;;  %v1230_v43 = vmax.f32 %v1214_v16, 0.0  ;;  %v1213_v46 = vadd.f32 %v1145_v20, %v1772_v45  ;;  %v1215_v18 = vadd.f32 %v1198_v21, %v1776_v47 }
 0x2d8   :  { %1241 = vst [vmem:[#allocation10 + $0x48] sm:$0xff] %v1225_v22  ;;  %1243 = vst [vmem:[#allocation10 + $0x58] sm:$0xff] %v1227_v23 }
 0x2d9   :  { %1244 = vst [vmem:[#allocation10 + $0x60] sm:$0xff] %v1228_v17  ;;  %1246 = vst [vmem:[#allocation10 + $0x70] sm:$0xff] %v1230_v43  ;;  %v1229_v51 = vmax.f32 %v1213_v46, 0.0  ;;  %v1231_v53 = vmax.f32 %v1215_v18, 0.0 }
 0x2db   :  { %1245 = vst [vmem:[#allocation10 + $0x68] sm:$0xff] %v1229_v51  ;;  %1247 = vst [vmem:[#allocation10 + $0x78] sm:$0xff] %v1231_v53 }
 0x2dc   :  { %1660 = shalt.err (!%p1657_p10)
}
 0x2dd   :  { %1259 = dma.vmem_to_hbm [thread:$0]  %s1254_s29, 2048, %s1892_s7, [#allocation4], %s1681_s11, %s1681_s11, %s1682_s12  }
 0x2de   :  { %1675 = dma.done.wait [#allocation4], 2048  }
 0x2df   :  { %1676 = vsyncadd [#allocation4], 4294965248 }
 0x2e0   :  { %1263 = vsyncpa [#allocation3], 1 }
 0x2e1   :  { %1264 = vsyncpa [#allocation6], 1 }
 0x2e2   :  { %1265 = vsyncpa [#allocation9], 1 }
 0x2e3   :  { %1266 = vsyncpa [#allocation4], 1 }

</bundles_post_ra>
